<compile_context>
chip_gen: v6e
topology: v6e:2x2x1
jax: 0.10.0
libtpu: 0.0.40
codegen_flags: <defaults>
</compile_context>

<pallas_src>
import functools

import jax
import jax.numpy as jnp
from jax.experimental import pallas as pl
from jax.experimental.pallas import tpu as pltpu


# -----------------------------------------------------------------------------
# Pallas kernel: single invocation, batch folded into the matmul M dimension.
# -----------------------------------------------------------------------------
def _vshifted(t, H):
    """Return (up, dn) with up[r] = t[r-1], dn[r] = t[r+1] within each H-row
    image, zero at image borders.  Batch is folded into the row axis, so rows
    with r % H == 0 / H-1 are masked to stop vertical taps leaking between
    images (this also cancels the cyclic wrap of the roll)."""
    n_rows = t.shape[0]
    rid = jax.lax.broadcasted_iota(jnp.int32, t.shape, 0) % H
    up = jnp.where(rid != 0, pltpu.roll(t, 1, axis=0), 0.0)
    dn = jnp.where(rid != H - 1, pltpu.roll(t, n_rows - 1, axis=0), 0.0)
    return up, dn


def block_kernel(x_ref, m1_ref, b1_ref, m2_ref, bo_ref, o_ref, *, H):
    f32, bf16 = jnp.float32, jnp.bfloat16

    # First ReLU of `rep`; it is inplace in PyTorch, so the skip branch also
    # operates on relu(x).  Padded input channels are zero and stay zero.
    a = jnp.maximum(x_ref[...], 0.0)                         # (N*H, W*Cp) f32

    # ---- stage 1: SepConv(4->8) + BNs + ReLU  == ONE matmul over K-concat ----
    a_up, a_dn = _vshifted(a, H)
    lhs1 = jnp.concatenate([a_up, a, a_dn], axis=1).astype(bf16)   # (N*H, 3*W*Cp)
    y1 = jnp.dot(lhs1, m1_ref[...], preferred_element_type=f32)
    y1 = jnp.maximum(y1 + b1_ref[...], 0.0)                  # (N*H, W*Cout) f32

    # ---- stage 2: SepConv(8->8) + BNs, skip 1x1(+BN) folded into the same K --
    y1_up, y1_dn = _vshifted(y1, H)
    lhs2 = jnp.concatenate([y1_up, y1, y1_dn, a], axis=1).astype(bf16)
    out = jnp.dot(lhs2, m2_ref[...], preferred_element_type=f32) + bo_ref[...]

    o_ref[...] = out.astype(o_ref.dtype)                     # one lane-dense store


# -----------------------------------------------------------------------------
# One-time parameter folding (plain JAX, outside the kernel)
# -----------------------------------------------------------------------------
def _fold_block_params(p, W, cin_pad):
    f32 = jnp.float32
    cin, cout = p["pw1"].shape
    cp = cin_pad

    # zero-pad stage-1 / skip params along the input-channel axis (cin -> cp)
    pad_last = lambda x: jnp.pad(x, [(0, 0)] * (x.ndim - 1) + [(0, cp - cin)])
    dw1 = pad_last(p["dw1"])                                  # (9, 1, cp)
    s_dw1 = pad_last(p["s_dw1"])                              # (1, cp)
    b_dw1 = pad_last(p["b_dw1"])                              # (1, cp)
    pw1 = jnp.pad(p["pw1"], ((0, cp - cin), (0, 0)))          # (cp, cout)
    skip_w = jnp.pad(p["skip_w"], ((0, cp - cin), (0, 0)))    # (cp, cout)

    # horizontal band selector: sel[w, v, dj] = 1 iff w == v + dj - 1
    wi = jnp.arange(W)[:, None, None]
    vi = jnp.arange(W)[None, :, None]
    ji = jnp.arange(3)[None, None, :]
    sel = (wi - vi + 1 == ji).astype(f32)                     # (W, W, 3)

    def fused(dw9, s_dw, pw, s_bn):
        c, d = pw.shape
        dw_eff = (dw9.reshape(9, c) * s_dw).reshape(3, 3, c)  # taps * dw-BN scale
        pw_eff = pw * s_bn                                    # cols * block-BN scale
        m = jnp.einsum("wvj,ijc,cd->iwcvd", sel, dw_eff, pw_eff)
        return m.reshape(3, W * c, W * d)                     # (3, W*c, W*d)

    m1 = fused(dw1, s_dw1, pw1, p["s_bn1"])                   # (3, W*cp,   W*cout)
    m2 = fused(p["dw2"], p["s_dw2"], p["pw2"], p["s_bn2"])    # (3, W*cout, W*cout)
    wsk = jnp.kron(jnp.eye(W, dtype=f32), skip_w * p["s_skip"])   # (W*cp, W*cout)

    bias1 = (b_dw1 @ pw1) * p["s_bn1"] + p["b_bn1"]           # (1, cout)
    bias2 = (p["b_dw2"] @ p["pw2"]) * p["s_bn2"] + p["b_bn2"] # (1, cout)

    # K-concatenated bf16 MXU weights (biases stay f32)
    m1cat = jnp.concatenate([m1[0], m1[1], m1[2]], axis=0).astype(jnp.bfloat16)
    m2cat = jnp.concatenate([m2[0], m2[1], m2[2], wsk], axis=0).astype(jnp.bfloat16)
    return dict(
        m1cat=m1cat,                                          # (3*W*cp, W*cout)
        b1=jnp.tile(bias1, (1, W)),                           # (1, W*cout) f32
        m2cat=m2cat,                                          # (3*W*cout + W*cp, W*cout)
        bo=jnp.tile(bias2 + p["b_skip"], (1, W)),             # (1, W*cout) f32
    )


# -----------------------------------------------------------------------------
# Wrapper
# -----------------------------------------------------------------------------
def block_forward(x_nhwc, p, *, cin_pad=None):
    N, H, W, Cin = x_nhwc.shape
    Cout = p["pw1"].shape[1]
    Cp = Cin if cin_pad is None else cin_pad
    WCp, WCout = W * Cp, W * Cout
    NH = N * H

    fp = _fold_block_params(p, W, Cp)

    # lane-dense layout, batch folded into M: (N*H, W*Cp); padded channels zero
    x_pad = jnp.pad(x_nhwc, ((0, 0), (0, 0), (0, 0), (0, Cp - Cin)))
    x_lane = x_pad.reshape(NH, WCp).astype(jnp.float32)

    kernel = functools.partial(block_kernel, H=H)
    vmem = pl.BlockSpec(memory_space=pltpu.MemorySpace.VMEM)  # whole array in VMEM

    out_lane = pl.pallas_call(
        kernel,
        out_shape=jax.ShapeDtypeStruct((NH, WCout), jnp.float32),
        in_specs=[vmem, vmem, vmem, vmem, vmem],
        out_specs=vmem,
    )(x_lane, fp["m1cat"], fp["b1"], fp["m2cat"], fp["bo"])

    return out_lane.reshape(N, H, W, Cout)


# -----------------------------------------------------------------------------
# Deterministic parameter construction (folded inference-mode BatchNorm)
# -----------------------------------------------------------------------------
def make_params(key, cin, cout):
    ks = iter(jax.random.split(key, 32))

    def bn_fold(c):
        gamma = 1.0 + 0.2 * jax.random.normal(next(ks), (c,), jnp.float32)
        beta = 0.1 * jax.random.normal(next(ks), (c,), jnp.float32)
        mean = 0.1 * jax.random.normal(next(ks), (c,), jnp.float32)
        var = 0.5 + jax.random.uniform(next(ks), (c,), jnp.float32)
        scale = gamma / jnp.sqrt(var + 1e-5)
        bias = beta - mean * scale
        return scale.reshape(1, c), bias.reshape(1, c)

    p = {}
    # SeparableConv2d #1 : depthwise(4), BN(4), pointwise(4->8)  + block BN(8)
    p["dw1"] = jax.random.normal(next(ks), (9, 1, cin), jnp.float32) / 3.0
    p["s_dw1"], p["b_dw1"] = bn_fold(cin)
    p["pw1"] = (jax.random.normal(next(ks), (cin, cout), jnp.float32)
                / jnp.sqrt(float(cin)))
    p["s_bn1"], p["b_bn1"] = bn_fold(cout)
    # SeparableConv2d #2 : depthwise(8), BN(8), pointwise(8->8)  + block BN(8)
    p["dw2"] = jax.random.normal(next(ks), (9, 1, cout), jnp.float32) / 3.0
    p["s_dw2"], p["b_dw2"] = bn_fold(cout)
    p["pw2"] = (jax.random.normal(next(ks), (cout, cout), jnp.float32)
                / jnp.sqrt(float(cout)))
    p["s_bn2"], p["b_bn2"] = bn_fold(cout)
    # skip: Conv1x1(4->8) + BN(8)
    p["skip_w"] = (jax.random.normal(next(ks), (cin, cout), jnp.float32)
                   / jnp.sqrt(float(cin)))
    p["s_skip"], p["b_skip"] = bn_fold(cout)
    return p


# -----------------------------------------------------------------------------
# Pure-JAX reference (NHWC) for verification
# -----------------------------------------------------------------------------
def _depthwise_ref(inp, w9):
    c = inp.shape[-1]
    w = w9.reshape(3, 3, 1, c)
    return jax.lax.conv_general_dilated(
        inp, w, window_strides=(1, 1), padding=((1, 1), (1, 1)),
        dimension_numbers=("NHWC", "HWIO", "NHWC"),
        feature_group_count=c, precision=jax.lax.Precision.HIGHEST)


def block_ref(x_nhwc, p):
    def bn(h, s, b):
        return h * s.reshape(1, 1, 1, -1) + b.reshape(1, 1, 1, -1)

    a = jnp.maximum(x_nhwc, 0.0)            # inplace ReLU: skip sees it too
    h = _depthwise_ref(a, p["dw1"])
    h = bn(h, p["s_dw1"], p["b_dw1"])
    h = jnp.einsum("nhwc,cd->nhwd", h, p["pw1"],
                   precision=jax.lax.Precision.HIGHEST)
    h = bn(h, p["s_bn1"], p["b_bn1"])
    h = jnp.maximum(h, 0.0)
    h = _depthwise_ref(h, p["dw2"])
    h = bn(h, p["s_dw2"], p["b_dw2"])
    h = jnp.einsum("nhwc,cd->nhwd", h, p["pw2"],
                   precision=jax.lax.Precision.HIGHEST)
    h = bn(h, p["s_bn2"], p["b_bn2"])
    sk = jnp.einsum("nhwc,cd->nhwd", a, p["skip_w"],
                    precision=jax.lax.Precision.HIGHEST)
    sk = bn(sk, p["s_skip"], p["b_skip"])
    return h + sk


# -----------------------------------------------------------------------------
if __name__ == "__main__":
    N, Cin, Cout, H, W = 2, 4, 8, 16, 16

    key = jax.random.PRNGKey(0)
    k_x, k_p = jax.random.split(key)
    x_nchw = jax.random.normal(k_x, (N, Cin, H, W), jnp.float32)   # PyTorch NCHW
    params = make_params(k_p, Cin, Cout)

    # layout: NCHW (PyTorch) -> NHWC (kernel) -> NCHW (result)
    x_nhwc = jnp.transpose(x_nchw, (0, 2, 3, 1))
    out_nhwc = block_forward(x_nhwc, params, cin_pad=8)   # pad Cin 4->8 => 128 lanes
    jax.block_until_ready(out_nhwc)
    out_nchw = jnp.transpose(out_nhwc, (0, 3, 1, 2))

    ref_nchw = jnp.transpose(block_ref(x_nhwc, params), (0, 3, 1, 2))
    max_err = float(jnp.max(jnp.abs(out_nchw - ref_nchw)))
    assert out_nchw.shape == (N, Cout, H, W)
    # Tolerance loosened vs the f32 version: kernel matmuls use bf16 MXU
    # operands (f32 accumulation) while the reference is HIGHEST-precision f32.
    assert max_err < 2.5e-1, f"mismatch vs reference: {max_err}"

    print("KERNEL_OK")
</pallas_src>

<mosaic_0001>
module attributes {stable_mosaic.version = 11 : i64} {
  func.func @block_kernel(%arg0: memref<32x128xf32, #tpu.memory_space<vmem>>, %arg1: memref<384x128xbf16, #tpu.memory_space<vmem>>, %arg2: memref<1x128xf32, #tpu.memory_space<vmem>>, %arg3: memref<512x128xbf16, #tpu.memory_space<vmem>>, %arg4: memref<1x128xf32, #tpu.memory_space<vmem>>, %arg5: memref<32x128xf32, #tpu.memory_space<vmem>>) attributes {dimension_semantics = [], scalar_prefetch = 0 : i64, scratch_operands = 0 : i64, tpu.core_type = #tpu.core_type<tc>} {
    %c0 = arith.constant 0 : index
    %c0_0 = arith.constant 0 : index
    %0 = vector.load %arg0[%c0, %c0_0] : memref<32x128xf32, #tpu.memory_space<vmem>>, vector<32x128xf32>
    %cst = arith.constant 0.000000e+00 : f32
    %1 = vector.broadcast %cst : f32 to vector<32x128xf32>
    %2 = arith.maximumf %0, %1 : vector<32x128xf32>
    %3 = tpu.iota {dimensions = array<i32: 0>} : vector<32x128xi32>
    %c16_i32 = arith.constant 16 : i32
    %c0_i32 = arith.constant 0 : i32
    %4 = arith.cmpi eq, %c16_i32, %c0_i32 : i32
    %c1_i32 = arith.constant 1 : i32
    %5 = arith.select %4, %c1_i32, %c16_i32 : i32
    %6 = vector.broadcast %5 : i32 to vector<32x128xi32>
    %7 = arith.remsi %3, %6 : vector<32x128xi32>
    %c0_i32_1 = arith.constant 0 : i32
    %8 = vector.broadcast %c0_i32_1 : i32 to vector<32x128xi32>
    %9 = arith.cmpi ne, %7, %8 : vector<32x128xi32>
    %c0_i32_2 = arith.constant 0 : i32
    %10 = vector.broadcast %c0_i32_2 : i32 to vector<32x128xi32>
    %11 = arith.cmpi slt, %7, %10 : vector<32x128xi32>
    %c0_i32_3 = arith.constant 0 : i32
    %12 = arith.cmpi slt, %5, %c0_i32_3 : i32
    %13 = vector.broadcast %12 : i1 to vector<32x128xi1>
    %14 = vector.broadcast %13 : vector<32x128xi1> to vector<32x128xi1>
    %15 = arith.xori %11, %14 : vector<32x128xi1>
    %16 = arith.andi %15, %9 : vector<32x128xi1>
    %17 = vector.broadcast %5 : i32 to vector<32x128xi32>
    %18 = arith.addi %7, %17 : vector<32x128xi32>
    %19 = arith.select %16, %18, %7 : vector<32x128xi1>, vector<32x128xi32>
    %c0_i32_4 = arith.constant 0 : i32
    %20 = vector.broadcast %c0_i32_4 : i32 to vector<32x128xi32>
    %21 = arith.cmpi ne, %19, %20 : vector<32x128xi32>
    %c1_i32_5 = arith.constant 1 : i32
    %22 = tpu.dynamic_rotate %2 by %c1_i32_5 dim 0 : vector<32x128xf32>, i32 -> vector<32x128xf32>
    %cst_6 = arith.constant 0.000000e+00 : f32
    %23 = vector.broadcast %cst_6 : f32 to vector<32x128xf32>
    %24 = arith.select %21, %22, %23 : vector<32x128xi1>, vector<32x128xf32>
    %c15_i32 = arith.constant 15 : i32
    %25 = vector.broadcast %c15_i32 : i32 to vector<32x128xi32>
    %26 = arith.cmpi ne, %19, %25 : vector<32x128xi32>
    %c31_i32 = arith.constant 31 : i32
    %27 = tpu.dynamic_rotate %2 by %c31_i32 dim 0 : vector<32x128xf32>, i32 -> vector<32x128xf32>
    %cst_7 = arith.constant 0.000000e+00 : f32
    %28 = vector.broadcast %cst_7 : f32 to vector<32x128xf32>
    %29 = arith.select %26, %27, %28 : vector<32x128xi1>, vector<32x128xf32>
    %30 = tpu.concatenate %24, %2, %29 in 1 : vector<32x128xf32>, vector<32x128xf32>, vector<32x128xf32> -> vector<32x384xf32>
    %31 = arith.truncf %30 : vector<32x384xf32> to vector<32x384xbf16>
    %c0_8 = arith.constant 0 : index
    %c0_9 = arith.constant 0 : index
    %32 = vector.load %arg1[%c0_8, %c0_9] : memref<384x128xbf16, #tpu.memory_space<vmem>>, vector<384x128xbf16>
    %cst_10 = arith.constant dense<0.000000e+00> : vector<32x128xf32>
    %33 = tpu.matmul %31, %32, %cst_10 {dimension_numbers = #tpu.dot_dimension_numbers<[1], [0], [0], [1], [0, 0, 1, 1], [], []>} : vector<32x384xbf16>, vector<384x128xbf16>, vector<32x128xf32> -> vector<32x128xf32>
    %c0_11 = arith.constant 0 : index
    %c0_12 = arith.constant 0 : index
    %34 = vector.load %arg2[%c0_11, %c0_12] : memref<1x128xf32, #tpu.memory_space<vmem>>, vector<1x128xf32>
    %35 = vector.broadcast %34 : vector<1x128xf32> to vector<32x128xf32>
    %36 = arith.addf %33, %35 : vector<32x128xf32>
    %cst_13 = arith.constant 0.000000e+00 : f32
    %37 = vector.broadcast %cst_13 : f32 to vector<32x128xf32>
    %38 = arith.maximumf %36, %37 : vector<32x128xf32>
    %39 = tpu.iota {dimensions = array<i32: 0>} : vector<32x128xi32>
    %c16_i32_14 = arith.constant 16 : i32
    %c0_i32_15 = arith.constant 0 : i32
    %40 = arith.cmpi eq, %c16_i32_14, %c0_i32_15 : i32
    %c1_i32_16 = arith.constant 1 : i32
    %41 = arith.select %40, %c1_i32_16, %c16_i32_14 : i32
    %42 = vector.broadcast %41 : i32 to vector<32x128xi32>
    %43 = arith.remsi %39, %42 : vector<32x128xi32>
    %c0_i32_17 = arith.constant 0 : i32
    %44 = vector.broadcast %c0_i32_17 : i32 to vector<32x128xi32>
    %45 = arith.cmpi ne, %43, %44 : vector<32x128xi32>
    %c0_i32_18 = arith.constant 0 : i32
    %46 = vector.broadcast %c0_i32_18 : i32 to vector<32x128xi32>
    %47 = arith.cmpi slt, %43, %46 : vector<32x128xi32>
    %c0_i32_19 = arith.constant 0 : i32
    %48 = arith.cmpi slt, %41, %c0_i32_19 : i32
    %49 = vector.broadcast %48 : i1 to vector<32x128xi1>
    %50 = vector.broadcast %49 : vector<32x128xi1> to vector<32x128xi1>
    %51 = arith.xori %47, %50 : vector<32x128xi1>
    %52 = arith.andi %51, %45 : vector<32x128xi1>
    %53 = vector.broadcast %41 : i32 to vector<32x128xi32>
    %54 = arith.addi %43, %53 : vector<32x128xi32>
    %55 = arith.select %52, %54, %43 : vector<32x128xi1>, vector<32x128xi32>
    %c0_i32_20 = arith.constant 0 : i32
    %56 = vector.broadcast %c0_i32_20 : i32 to vector<32x128xi32>
    %57 = arith.cmpi ne, %55, %56 : vector<32x128xi32>
    %c1_i32_21 = arith.constant 1 : i32
    %58 = tpu.dynamic_rotate %38 by %c1_i32_21 dim 0 : vector<32x128xf32>, i32 -> vector<32x128xf32>
    %cst_22 = arith.constant 0.000000e+00 : f32
    %59 = vector.broadcast %cst_22 : f32 to vector<32x128xf32>
    %60 = arith.select %57, %58, %59 : vector<32x128xi1>, vector<32x128xf32>
    %c15_i32_23 = arith.constant 15 : i32
    %61 = vector.broadcast %c15_i32_23 : i32 to vector<32x128xi32>
    %62 = arith.cmpi ne, %55, %61 : vector<32x128xi32>
    %c31_i32_24 = arith.constant 31 : i32
    %63 = tpu.dynamic_rotate %38 by %c31_i32_24 dim 0 : vector<32x128xf32>, i32 -> vector<32x128xf32>
    %cst_25 = arith.constant 0.000000e+00 : f32
    %64 = vector.broadcast %cst_25 : f32 to vector<32x128xf32>
    %65 = arith.select %62, %63, %64 : vector<32x128xi1>, vector<32x128xf32>
    %66 = tpu.concatenate %60, %38, %65, %2 in 1 : vector<32x128xf32>, vector<32x128xf32>, vector<32x128xf32>, vector<32x128xf32> -> vector<32x512xf32>
    %67 = arith.truncf %66 : vector<32x512xf32> to vector<32x512xbf16>
    %c0_26 = arith.constant 0 : index
    %c0_27 = arith.constant 0 : index
    %68 = vector.load %arg3[%c0_26, %c0_27] : memref<512x128xbf16, #tpu.memory_space<vmem>>, vector<512x128xbf16>
    %cst_28 = arith.constant dense<0.000000e+00> : vector<32x128xf32>
    %69 = tpu.matmul %67, %68, %cst_28 {dimension_numbers = #tpu.dot_dimension_numbers<[1], [0], [0], [1], [0, 0, 1, 1], [], []>} : vector<32x512xbf16>, vector<512x128xbf16>, vector<32x128xf32> -> vector<32x128xf32>
    %c0_29 = arith.constant 0 : index
    %c0_30 = arith.constant 0 : index
    %70 = vector.load %arg4[%c0_29, %c0_30] : memref<1x128xf32, #tpu.memory_space<vmem>>, vector<1x128xf32>
    %71 = vector.broadcast %70 : vector<1x128xf32> to vector<32x128xf32>
    %72 = arith.addf %69, %71 : vector<32x128xf32>
    %c0_31 = arith.constant 0 : index
    %c0_32 = arith.constant 0 : index
    %73 = vector.load %arg5[%c0_31, %c0_32] : memref<32x128xf32, #tpu.memory_space<vmem>>, vector<32x128xf32>
    tpu.vector_store %arg5[%c0_31, %c0_32], %72 {strides = array<i32>} : memref<32x128xf32, #tpu.memory_space<vmem>>, vector<32x128xf32>,
    return
  }
}

</mosaic_0001>

<bundles_post_ra>
// kernel: tpu_custom_call.1
= control target key start
LH: loop header
LB: loop body
LE: loop exit
PB: predicated region body
PF: predicated region fallthrough
CT: control target
= control target key end

     0   :  { %10 = vsyncpa [#allocation3], 0  ;;  %s1386_s0 = inlined_call_operand.hbm [shape: f32[32,128], index: 0, kind: input, shape index: {}]   ;;  %s1387_s1 = inlined_call_operand.hbm [shape: bf16[384,128], index: 1, kind: input, shape index: {}]   ;;  %s1388_s2 = inlined_call_operand.vmem [shape: f32[1,128], index: 2, kind: input, shape index: {}]   ;;  %s1389_s3 = inlined_call_operand.hbm [shape: bf16[512,128], index: 3, kind: input, shape index: {}]   ;;  %s1390_s4 = inlined_call_operand.vmem [shape: f32[1,128], index: 4, kind: input, shape index: {}]   ;;  %s1391_s5 = inlined_call_operand.hbm [shape: f32[32,128], index: 5, kind: output, shape index: {}]  }
   0x1   :  { %11 = vsyncpa [#allocation6], 0 }
   0x2   :  { %12 = vsyncpa [#allocation4], 0  ;;  %s1225_s18 = smov [#allocation5]  }
   0x3   :  { %s30_s19 = sshll.u32 %s1225_s18, 4  ;;  %s31_s19 = int_to_ptr.vmem [resolvable:$true] %s30_s19 }
   0x4   :  { %s1147_s20 = scalar_lea.vmem %s31_s19, 3072  ;;  %p1152_p1 = scmp.lt.s32.totalorder %s31_s19, %s31_s19 }
   0x5   :  { %p1148_p0 = scmp.ne.s32.totalorder %s31_s19, %s1147_s20  ;;  %p1153_p2 = scmp.lt.s32.totalorder %s1147_s20, %s1147_s20 }
   0x7   :  { %p1154_p3 = por %p1153_p2, %p1152_p1 }
   0x9   :  { %p1155_p4 = pnand %p1154_p3, %p1148_p0 }
   0xb   :  { %1158 = shalt.err (!%p1155_p4)
}
   0xc   :  { %s1226_s21 = smov 64   ;;  %s1227_s22 = smov 4  }
   0xd   :  { %36 = dma.hbm_to_vmem [thread:$0]  %s1387_s1, 3072, %s31_s19, [#allocation6], %s1226_s21, %s1226_s21, %s1227_s22  }
   0xe   :  { %s1228_s25 = smov [#allocation2]  }
   0xf   :  { %s18_s26 = sshll.u32 %s1228_s25, 4  ;;  %s19_s26 = int_to_ptr.vmem [resolvable:$true] %s18_s26 }
  0x10   :  { %s1167_s27 = scalar_lea.vmem %s19_s26, 512  ;;  %p1172_p6 = scmp.lt.s32.totalorder %s19_s26, %s19_s26 }
  0x11   :  { %p1168_p5 = scmp.ne.s32.totalorder %s19_s26, %s1167_s27  ;;  %p1173_p7 = scmp.lt.s32.totalorder %s1167_s27, %s1167_s27 }
  0x13   :  { %p1174_p8 = por %p1173_p7, %p1172_p6 }
  0x15   :  { %p1175_p9 = pnand %p1174_p8, %p1168_p5 }
  0x17   :  { %1178 = shalt.err (!%p1175_p9)
}
  0x18   :  { %s1229_s28 = smov 128   ;;  %s1230_s29 = smov 8  }
  0x19   :  { %24 = dma.hbm_to_vmem [thread:$0]  %s1386_s0, 512, %s19_s26, [#allocation3], %s1229_s28, %s1229_s28, %s1230_s29  }
  0x1a   :  { %s1231_s1 = smov [#allocation7]  }
  0x1b   :  { %s44_s7 = sshll.u32 %s1231_s1, 4  ;;  %s45_s7 = int_to_ptr.vmem [resolvable:$true] %s44_s7 }
  0x1c   :  { %s1187_s8 = scalar_lea.vmem %s45_s7, 4096  ;;  %p1192_p11 = scmp.lt.s32.totalorder %s45_s7, %s45_s7 }
  0x1d   :  { %p1188_p10 = scmp.ne.s32.totalorder %s45_s7, %s1187_s8  ;;  %p1193_p12 = scmp.lt.s32.totalorder %s1187_s8, %s1187_s8 }
  0x1f   :  { %p1194_p13 = por %p1193_p12, %p1192_p11 }
  0x21   :  { %p1195_p0 = pnand %p1194_p13, %p1188_p10 }
  0x23   :  { %1198 = shalt.err (!%p1195_p0)
}
  0x24   :  { %50 = dma.hbm_to_vmem [thread:$0]  %s1389_s3, 4096, %s45_s7, [#allocation6], %s1226_s21, %s1226_s21, %s1227_s22  }
  0x25   :  { %1219 = dma.done.wait [#allocation3], 512  }
  0x26   :  { %1220 = vsyncadd [#allocation3], 4294966784 }
  0x27   :  { %1221 = dma.done.wait [#allocation6], 7168  }
  0x28   :  { %1222 = vsyncadd [#allocation6], 4294960128  ;;  %v1083_v0 = vld [vmem:[#allocation5 + $0x78] sm:$0xff]   ;;  %v1085_v2 = vld [vmem:[#allocation5 + $0x70] sm:$0xff]   ;;  %v71_v8 = vlaneseq  ;;  %vm1232_vm5 = vmmov 1  }
  0x29   :  { %v1084_v1 = vld [vmem:[#allocation5 + $0x38] sm:$0xff]   ;;  %960 = vmatprep.subr.bf16.mxu0 %v1083_v0  ;;  %v1087_v4 = vld [vmem:[#allocation5 + $0x30] sm:$0xff]   ;;  %v1088_v5 = vld [vmem:[#allocation5 + $0x68] sm:$0xff]  }
  0x2a   :  { %961 = vmatpush3.bf16.msra.mxu0 %v1084_v1  ;;  %v1086_v3 = vld [vmem:[#allocation5 + $0xb8] sm:$0xff]   ;;  %v1089_v6 = vld [vmem:[#allocation5 + $0xb0] sm:$0xff]   ;;  %v1090_v7 = vld [vmem:[#allocation5 + $0x28] sm:$0xff]   ;;  %v1276_v13 = vshrl.u32 %v71_v8, 7 }
  0x2b   :  { %962 = vmatprep.subr.bf16.mxu0 %v1085_v2  ;;  %1054 = vmatprep.subr.bf16.mxu1 %v1086_v3  ;;  %v1091_v9 = vld [vmem:[#allocation5 + $0x60] sm:$0xff]   ;;  %v1092_v10 = vld [vmem:[#allocation5 + $0xa8] sm:$0xff]   ;;  %v1094_v12 = vld [vmem:[#allocation5 + $0x58] sm:$0xff]  }
  0x2c   :  { %1055 = vmatpush3.bf16.msra.mxu1 %v1086_v3  ;;  %v1093_v11 = vld [vmem:[#allocation5 + $0x20] sm:$0xff]   ;;  %v1096_v15 = vld [vmem:[#allocation5 + $0x18] sm:$0xff]   ;;  %v73_v17 = vadd.s32 8, %v1276_v13  ;;  %v1097_v18 = vld [vmem:[#allocation5 + $0x50] sm:$0xff]   ;;  %v80_v19 = vand.u32 15, %v1276_v13  ;;  %v75_v20 = vadd.s32 24, %v1276_v13 }
  0x2d   :  { %1056 = vmatprep.subr.bf16.mxu1 %v1089_v6  ;;  %v1095_v14 = vld [vmem:[#allocation5 + $0xa0] sm:$0xff]   ;;  %v1098_v16 = vld [vmem:[#allocation5 + $0x98] sm:$0xff]   ;;  %v1099_v21 = vld [vmem:[#allocation5 + $0x10] sm:$0xff]   ;;  %v74_v22 = vadd.s32 16, %v1276_v13  ;;  %vm132_vm0 = vcmp.lt.s32.totalorder %v1276_v13, 1  ;;  %vm149_vm3 = vcmp.lt.s32.totalorder %v1276_v13, 7 }
  0x2e   :  { %963 = vmatpush3.bf16.msra.mxu0 %v1087_v4  ;;  %v1101_v23 = vld [vmem:[#allocation5 + $0x90] sm:$0xff]   ;;  %v87_v24 = vand.u32 15, %v73_v17  ;;  %v1100_v25 = vld [vmem:[#allocation5 + $0x48] sm:$0xff]   ;;  %v101_v27 = vand.u32 15, %v75_v20  ;;  %v63_v29 = vld [vmem:[#allocation2] sm:$0xff]  ;;  %vm1283_vm1 = vcmp.ne.s32.totalorder %v80_v19, 0 }
  0x2f   :  { %964 = vmatprep.subr.bf16.mxu0 %v1088_v5  ;;  %v1102_v26 = vld [vmem:[#allocation5 + $0x8] sm:$0xff]   ;;  %v66_v31 = vld [vmem:[#allocation2 + $0x18] sm:$0xff]  ;;  %v94_v34 = vand.u32 15, %v74_v22  ;;  %v1103_v35 = vld [vmem:[#allocation5 + $0x40] sm:$0xff]   ;;  %v67_v36 = vmax.f32 %v63_v29, 0.0 }
  0x30   :  { %1057 = vmatpush3.bf16.msra.mxu1 %v1089_v6  ;;  %v1104_v28 = vld [vmem:[#allocation5 + $0x88] sm:$0xff]   ;;  %vm1287_vm2 = vcmp.ne.s32.totalorder %v87_v24, 15  ;;  %v70_v38 = vmax.f32 %v66_v31, 0.0  ;;  %v1105_v39 = vld [vmem:[#allocation5] sm:$0xff]   ;;  %v65_v40 = vld [vmem:[#allocation2 + $0x10] sm:$0xff]  ;;  %vm1292_vm4 = vcmp.ne.s32.totalorder %v101_v27, 15 }
  0x31   :  { %1058 = vmatprep.subr.bf16.mxu1 %v1092_v10  ;;  %v64_v30 = vld [vmem:[#allocation2 + $0x8] sm:$0xff]  ;;  %v128_v42 = vrot.slane %v67_v36, 7  ;;  %vm1299_vm6 = vmpackc.low %vm1232_vm5, %vm1283_vm1  ;;  %v1106_v47 = vld [vmem:[#allocation5 + $0x80] sm:$0xff]   ;;  %v69_v48 = vmax.f32 %v65_v40, 0.0  ;;  %v145_v49 = vrot.slane %v67_v36, 1  ;;  %vm126_vm9 = vcmp.ne.s32.totalorder %v94_v34, 0 }
  0x32   :  { %965 = vmatpush3.bf16.msra.mxu0 %v1090_v7  ;;  %v68_v37 = vmax.f32 %v64_v30, 0.0  ;;  %v131_v45 = vrot.slane %v70_v38, 7  ;;  %vm1306_vm7 = vmpackc.low %vm1287_vm2, %vm1232_vm5  ;;  %v148_v52 = vrot.slane %v70_v38, 1  ;;  %v1109_v58 = vld [vmem:[#allocation7 + $0x78] sm:$0xff]   ;;  %v1110_v7 = vld [vmem:[#allocation7 + $0xf0] sm:$0xff]  }
  0x33   :  { %966 = vmatprep.subr.bf16.mxu0 %v1091_v9  ;;  %vm1317_vm8 = vmpackc.low %vm1292_vm4, %vm1232_vm5  ;;  %v147_v56 = vrot.slane %v69_v48, 1  ;;  %v1107_v61 = vld [vmem:[#allocation7 + $0xf8] sm:$0xff]   ;;  %v1329_v0 = vpack.c.bf16 %v70_v38, %v69_v48  ;;  %v130_v1 = vrot.slane %v69_v48, 7  ;;  %v1117_v17 = vld [vmem:[#allocation7 + $0x68] sm:$0xff]  }
  0x34   :  { %1059 = vmatpush3.bf16.msra.mxu1 %v1092_v10  ;;  %v129_v43 = vrot.slane %v68_v37, 7  ;;  %v159_v44 = vpack.c.bf16 %v68_v37, %v67_v36  ;;  %v146_v50 = vrot.slane %v68_v37, 1  ;;  %v136_v54 = vsel %vm132_vm0, %v131_v45, %v128_v42  ;;  %vm1332_vm10 = vmpackc.low %vm1232_vm5, %vm126_vm9  ;;  %v1108_v4 = vld [vmem:[#allocation7 + $0xb8] sm:$0xff]   ;;  %v1112_v10 = vld [vmem:[#allocation7 + $0xb0] sm:$0xff]  }
  0x35   :  { %1060 = vmatprep.subr.bf16.mxu1 %v1095_v14  ;;  %v153_v60 = vsel %vm149_vm3, %v148_v52, %v145_v49  ;;  %v150_v63 = vsel %vm149_vm3, %v147_v56, %v148_v52  ;;  %v1111_v5 = vld [vmem:[#allocation7 + $0x38] sm:$0xff]   ;;  %v133_v8 = vsel %vm132_vm0, %v130_v1, %v131_v45  ;;  %v1119_v19 = vld [vmem:[#allocation7 + $0x28] sm:$0xff]   ;;  %v1120_v20 = vld [vmem:[#allocation7 + $0xa0] sm:$0xff]  }
  0x36   :  { %967 = vmatpush3.bf16.msra.mxu0 %v1093_v11  ;;  %395 = vmatprep.mubr.bf16.mxu0 %v159_v44  ;;  %v135_v53 = vsel %vm132_vm0, %v128_v42, %v129_v43  ;;  %v152_v57 = vsel %vm149_vm3, %v145_v49, %v146_v50  ;;  %v151_v62 = vsel %vm149_vm3, %v146_v50, %v147_v56  ;;  %v1122_v22 = vld [vmem:[#allocation7 + $0xd8] sm:$0xff]   ;;  %v1129_v29 = vld [vmem:[#allocation7 + $0x50] sm:$0xff]   ;;  %v1130_v30 = vld [vmem:[#allocation7 + $0xc8] sm:$0xff]  }
  0x37   :  { %968 = vmatprep.subr.bf16.mxu0 %v1094_v12  ;;  %v904_v59 = vpack.c.bf16 %v135_v53, %v136_v54  ;;  %v910_v3 = vpack.c.bf16 %v151_v62, %v152_v57  ;;  %v913_v6 = vpack.c.bf16 %v153_v60, %v150_v63  ;;  %v134_v9 = vsel %vm132_vm0, %v129_v43, %v130_v1  ;;  %v1113_v12 = vld [vmem:[#allocation7 + $0x70] sm:$0xff]   ;;  %v1124_v24 = vld [vmem:[#allocation7 + $0x98] sm:$0xff]   ;;  %v1132_v32 = vld [vmem:[#allocation7 + $0x88] sm:$0xff]  }
  0x38   :  { %1061 = vmatpush3.bf16.msra.mxu1 %v1095_v14  ;;  %v907_v11 = vpack.c.bf16 %v133_v8, %v134_v9  ;;  %v1114_v14 = vld [vmem:[#allocation7 + $0xe8] sm:$0xff]   ;;  %v1127_v27 = vld [vmem:[#allocation7 + $0x18] sm:$0xff]   ;;  %v1131_v31 = vld [vmem:[#allocation7 + $0x10] sm:$0xff]  }
  0x39   :  { %1062 = vmatprep.subr.bf16.mxu1 %v1098_v16  ;;  %1070 = vmatprep.mubr.msk.bf16.mxu1 %vm1306_vm7, %v910_v3  ;;  %v1133_v33 = vld [vmem:[#allocation7 + $0x48] sm:$0xff]   ;;  %v1134_v34 = vld [vmem:[#allocation7 + $0xc0] sm:$0xff]  }
  0x3a   :  { %969 = vmatpush3.bf16.msra.mxu0 %v1096_v15  ;;  %v1115_v15 = vld [vmem:[#allocation7 + $0x30] sm:$0xff]   ;;  %v1136_v36 = vld [vmem:[#allocation7 + $0x80] sm:$0xff]  }
  0x3b   :  { %970 = vmatprep.subr.bf16.mxu0 %v1097_v18  ;;  %v1118_v18 = vld [vmem:[#allocation7 + $0xe0] sm:$0xff]  }
  0x3c   :  { %1063 = vmatpush3.bf16.msra.mxu1 %v1098_v16  ;;  %v1116_v16 = vld [vmem:[#allocation7 + $0xa8] sm:$0xff]   ;;  %v1137_v37 = vld [vmem:[#allocation7 + $0x40] sm:$0xff]  }
  0x3d   :  { %1064 = vmatprep.subr.bf16.mxu1 %v1101_v23  ;;  %v1138_v38 = vld [vmem:[#allocation7] sm:$0xff]  }
  0x3e   :  { %971 = vmatpush3.bf16.msra.mxu0 %v1099_v21  ;;  %v1121_v21 = vld [vmem:[#allocation7 + $0x60] sm:$0xff]  }
  0x3f   :  { %972 = vmatprep.subr.bf16.mxu0 %v1100_v25  ;;  %v1125_v25 = vld [vmem:[#allocation7 + $0x58] sm:$0xff]   ;;  %v878_v43 = vld [vmem:[%s1388_s2] ss:$0 sm:$0xff] }
  0x40   :  { %1065 = vmatpush3.bf16.msra.mxu1 %v1101_v23  ;;  %v1123_v23 = vld [vmem:[#allocation7 + $0x20] sm:$0xff]  }
  0x41   :  { %1066 = vmatprep.subr.bf16.mxu1 %v1104_v28 }
  0x42   :  { %973 = vmatpush3.bf16.msra.mxu0 %v1102_v26  ;;  %v1126_v26 = vld [vmem:[#allocation7 + $0xd0] sm:$0xff]  }
  0x43   :  { %974 = vmatprep.subr.bf16.mxu0 %v1103_v35  ;;  %v1135_v35 = vld [vmem:[#allocation7 + $0x8] sm:$0xff]  }
  0x44   :  { %1067 = vmatpush3.bf16.msra.mxu1 %v1104_v28  ;;  %v1128_v28 = vld [vmem:[#allocation7 + $0x90] sm:$0xff]  }
  0x45   :  { %1068 = vmatprep.subr.bf16.mxu1 %v1106_v47 }
  0x46   :  { %975 = vmatpush3.bf16.msra.mxu0 %v1105_v39 }
  0x47   :  { %998 = vmatprep.subr.bf16.mxu0 %v1109_v58 }
  0x48   :  { %1069 = vmatpush3.bf16.msra.mxu1 %v1106_v47 }
  0x49   :  { %905 = vmatmul.mubr.msk.bf16.vlgmr.msra.gmra.mxu0 %vm1299_vm6, %v904_v59  ;;  %1026 = vmatprep.subr.bf16.mxu1 %v1107_v61 }
  0x4a   :  { %403 = vmatprep.mubr.bf16.mxu0 %v1329_v0  ;;  %999 = vmatpush3.bf16.msra.mxu0 %v1111_v5 }
  0x4b   :  { %1071 = vmatmul.mubr.msk.bf16.vlgmr.msra.gmra.mxu1 %vm1317_vm8, %v913_v6  ;;  %1000 = vmatprep.subr.bf16.mxu0 %v1113_v12 }
  0x4c   :  { %1027 = vmatpush3.bf16.msra.mxu1 %v1108_v4  ;;  %839 = vmatprep.mubr.bf16.mxu1 %v159_v44 }
  0x4d   :  { %1028 = vmatprep.subr.bf16.mxu1 %v1110_v7 }
  0x4e   :  { %1001 = vmatpush3.bf16.msra.mxu0 %v1115_v15 }
  0x4f   :  { %1002 = vmatprep.subr.bf16.mxu0 %v1117_v17 }
  0x50   :  { %1029 = vmatpush3.bf16.msra.mxu1 %v1112_v10 }
  0x51   :  { %908 = vmatmul.mubr.msk.bf16.gmra.mxu0 %vm1332_vm10, %v907_v11  ;;  %1030 = vmatprep.subr.bf16.mxu1 %v1114_v14 }
  0x52   :  { %1003 = vmatpush3.bf16.msra.mxu0 %v1119_v19 }
  0x53   :  { %1004 = vmatprep.subr.bf16.mxu0 %v1121_v21 }
  0x54   :  { %1031 = vmatpush3.bf16.msra.mxu1 %v1116_v16 }
  0x55   :  { %1032 = vmatprep.subr.bf16.mxu1 %v1118_v18 }
  0x56   :  { %1005 = vmatpush3.bf16.msra.mxu0 %v1123_v23 }
  0x57   :  { %1006 = vmatprep.subr.bf16.mxu0 %v1125_v25 }
  0x58   :  { %1033 = vmatpush3.bf16.msra.mxu1 %v1120_v20 }
  0x59   :  { %1034 = vmatprep.subr.bf16.mxu1 %v1122_v22 }
  0x5a   :  { %1007 = vmatpush3.bf16.msra.mxu0 %v1127_v27 }
  0x5b   :  { %1008 = vmatprep.subr.bf16.mxu0 %v1129_v29 }
  0x5c   :  { %1035 = vmatpush3.bf16.msra.mxu1 %v1124_v24 }
  0x5d   :  { %1036 = vmatprep.subr.bf16.mxu1 %v1126_v26 }
  0x5e   :  { %1009 = vmatpush3.bf16.msra.mxu0 %v1131_v31 }
  0x5f   :  { %1010 = vmatprep.subr.bf16.mxu0 %v1133_v33  ;;  %v915_v33 = vld [vmem:[%s1390_s4] ss:$0 sm:$0xff]  ;;  %s1233_s4 = smov [#allocation8]  }
  0x60   :  { %1037 = vmatpush3.bf16.msra.mxu1 %v1128_v28  ;;  %s865_s12 = sshll.u32 %s1233_s4, 4  ;;  %s866_s12 = int_to_ptr.vmem [resolvable:$true] %s865_s12 }
  0x61   :  { %1038 = vmatprep.subr.bf16.mxu1 %v1130_v30  ;;  %s1199_s13 = scalar_lea.vmem %s866_s12, 512  ;;  %p1204_p2 = scmp.lt.s32.totalorder %s866_s12, %s866_s12 }
  0x62   :  { %1011 = vmatpush3.bf16.msra.mxu0 %v1135_v35  ;;  %p1200_p1 = scmp.ne.s32.totalorder %s866_s12, %s1199_s13  ;;  %p1205_p3 = scmp.lt.s32.totalorder %s1199_s13, %s1199_s13 }
  0x63   :  { %1012 = vmatprep.subr.bf16.mxu0 %v1137_v37 }
  0x64   :  { %1039 = vmatpush3.bf16.msra.mxu1 %v1132_v32  ;;  %p1206_p4 = por %p1205_p3, %p1204_p2 }
  0x65   :  { %1040 = vmatprep.subr.bf16.mxu1 %v1134_v34 }
  0x66   :  { %1013 = vmatpush3.bf16.msra.mxu0 %v1138_v38  ;;  %p1207_p5 = pnand %p1206_p4, %p1200_p1 }
  0x68   :  { %1041 = vmatpush3.bf16.msra.mxu1 %v1136_v36 }
 0x109   :  { %v976_v39 = vpop.f32.mrf.mxu0 }
 0x10b   :  { %v977_v40 = vpop.f32.mrf.mxu0  ;;  %v1072_v42 = vpop.f32.mrf.mxu1 }
 0x10c   :  { %v978_v41 = vadd.f32 %v977_v40, %v976_v39 }
 0x10d   :  { %v979_v44 = vpop.f32.mrf.mxu0  ;;  %v446_v45 = vpop.f32.mrf.mxu1 }
 0x10e   :  { %v398_v48 = vadd.f32 %v978_v41, %v878_v43 }
 0x10f   :  { %v980_v47 = vpop.f32.mrf.mxu0  ;;  %v1073_v50 = vpop.f32.mrf.mxu1 }
 0x110   :  { %v981_v49 = vadd.f32 %v980_v47, %v979_v44  ;;  %v447_v56 = vadd.f32 %v446_v45, %v398_v48 }
 0x111   :  { %v982_v52 = vpop.f32.mrf.mxu0  ;;  %v449_v54 = vpop.f32.mrf.mxu1 }
 0x112   :  { %v401_v53 = vadd.f32 %v981_v49, %v878_v43  ;;  %v461_v63 = vmax.f32 %v447_v56, 0.0 }
 0x113   :  { %v983_v57 = vpop.f32.mrf.mxu0 }
 0x114   :  { %v984_v58 = vadd.f32 %v983_v57, %v982_v52  ;;  %v450_v59 = vadd.f32 %v449_v54, %v401_v53  ;;  %v477_v9 = vrot.slane %v461_v63, 1  ;;  %v465_v18 = vrot.slane %v461_v63, 7 }
 0x115   :  { %v985_v60 = vpop.f32.mrf.mxu0 }
 0x116   :  { %v406_v61 = vadd.f32 %v984_v58, %v878_v43  ;;  %v462_v62 = vmax.f32 %v450_v59, 0.0 }
 0x117   :  { %v986_v1 = vpop.f32.mrf.mxu0 }
 0x118   :  { %v455_v3 = vadd.f32 %v1072_v42, %v406_v61  ;;  %v987_v4 = vadd.f32 %v986_v1, %v985_v60  ;;  %v490_v5 = vpack.c.bf16 %v462_v62, %v461_v63  ;;  %v478_v7 = vrot.slane %v462_v62, 1 }
 0x119   :  { %v466_v12 = vrot.slane %v462_v62, 7 }
 0x11a   :  { %v463_v6 = vmax.f32 %v455_v3, 0.0  ;;  %v409_v8 = vadd.f32 %v987_v4, %v878_v43  ;;  %790 = vmatprep.mubr.bf16.mxu0 %v490_v5  ;;  %v483_v15 = vsel %vm149_vm3, %v477_v9, %v478_v7 }
 0x11b   :  { %v471_v21 = vsel %vm132_vm0, %v465_v18, %v466_v12 }
 0x11c   :  { %v479_v10 = vrot.slane %v463_v6, 1  ;;  %v458_v11 = vadd.f32 %v1073_v50, %v409_v8  ;;  %v467_v51 = vrot.slane %v463_v6, 7 }
 0x11e   :  { %v482_v14 = vsel %vm149_vm3, %v478_v7, %v479_v10  ;;  %v464_v16 = vmax.f32 %v458_v11, 0.0 }
 0x11f   :  { %v955_v17 = vpack.c.bf16 %v482_v14, %v483_v15 }
 0x120   :  { %v468_v19 = vrot.slane %v464_v16, 7  ;;  %v480_v20 = vrot.slane %v464_v16, 1  ;;  %v493_v24 = vpack.c.bf16 %v464_v16, %v463_v6 }
 0x121   :  { %956 = vmatmul.mubr.msk.bf16.vlgmr.msra.gmra.mxu1 %vm1306_vm7, %v955_v17 }
 0x122   :  { %v472_v22 = vsel %vm132_vm0, %v468_v19, %v465_v18  ;;  %847 = vmatprep.mubr.bf16.mxu1 %v1329_v0  ;;  %v481_v25 = vsel %vm149_vm3, %v479_v10, %v480_v20  ;;  %v484_v26 = vsel %vm149_vm3, %v480_v20, %v477_v9  ;;  %v469_v28 = vsel %vm132_vm0, %v467_v51, %v468_v19 }
 0x123   :  { %v949_v23 = vpack.c.bf16 %v471_v21, %v472_v22  ;;  %v958_v27 = vpack.c.bf16 %v484_v26, %v481_v25  ;;  %v470_v0 = vsel %vm132_vm0, %v466_v12, %v467_v51 }
 0x124   :  { %v952_v29 = vpack.c.bf16 %v469_v28, %v470_v0 }
 0x125   :  { %950 = vmatmul.mubr.msk.bf16.vlgmr.msra.gmra.mxu0 %vm1299_vm6, %v949_v23 }
 0x126   :  { %798 = vmatprep.mubr.bf16.mxu0 %v493_v24 }
 0x129   :  { %959 = vmatmul.mubr.msk.bf16.gmra.mxu1 %vm1317_vm8, %v958_v27 }
 0x12d   :  { %953 = vmatmul.mubr.msk.bf16.gmra.mxu0 %vm1332_vm10, %v952_v29 }
 0x1e1   :  { %v1042_v30 = vpop.f32.mrf.mxu1 }
 0x1e3   :  { %v1043_v31 = vpop.f32.mrf.mxu1 }
 0x1e4   :  { %v1044_v38 = vadd.f32 %v1043_v31, %v1042_v30 }
 0x1e5   :  { %v1014_v46 = vpop.f32.mrf.mxu0  ;;  %v1045_v32 = vpop.f32.mrf.mxu1 }
 0x1e7   :  { %v1015_v34 = vpop.f32.mrf.mxu0  ;;  %v1046_v35 = vpop.f32.mrf.mxu1 }
 0x1e8   :  { %v1016_v36 = vadd.f32 %v1015_v34, %v1014_v46  ;;  %v1047_v43 = vadd.f32 %v1046_v35, %v1045_v32 }
 0x1e9   :  { %v1017_v55 = vpop.f32.mrf.mxu0  ;;  %v1048_v37 = vpop.f32.mrf.mxu1 }
 0x1ea   :  { %v793_v13 = vadd.f32 %v1016_v36, %v915_v33 }
 0x1eb   :  { %v1018_v39 = vpop.f32.mrf.mxu0  ;;  %v1049_v40 = vpop.f32.mrf.mxu1 }
 0x1ec   :  { %v842_v41 = vadd.f32 %v1044_v38, %v793_v13  ;;  %v1019_v2 = vadd.f32 %v1018_v39, %v1017_v55  ;;  %v1050_v52 = vadd.f32 %v1049_v40, %v1048_v37 }
 0x1ed   :  { %v1020_v42 = vpop.f32.mrf.mxu0  ;;  %v1051_v45 = vpop.f32.mrf.mxu1 }
 0x1ee   :  { %856 = vst [vmem:[#allocation8] sm:$0xff] %v842_v41  ;;  %v796_v44 = vadd.f32 %v1019_v2, %v915_v33 }
 0x1ef   :  { %v1021_v47 = vpop.f32.mrf.mxu0  ;;  %v1052_v54 = vpop.f32.mrf.mxu1 }
 0x1f0   :  { %v845_v48 = vadd.f32 %v1047_v43, %v796_v44  ;;  %v1022_v49 = vadd.f32 %v1021_v47, %v1020_v42  ;;  %v1053_v59 = vadd.f32 %v1052_v54, %v1051_v45 }
 0x1f1   :  { %v1023_v50 = vpop.f32.mrf.mxu0 }
 0x1f2   :  { %857 = vst [vmem:[#allocation8 + $0x8] sm:$0xff] %v845_v48  ;;  %v801_v53 = vadd.f32 %v1022_v49, %v915_v33 }
 0x1f3   :  { %v1024_v56 = vpop.f32.mrf.mxu0 }
 0x1f4   :  { %v850_v57 = vadd.f32 %v1050_v52, %v801_v53  ;;  %v1025_v58 = vadd.f32 %v1024_v56, %v1023_v50 }
 0x1f6   :  { %858 = vst [vmem:[#allocation8 + $0x10] sm:$0xff] %v850_v57  ;;  %v804_v60 = vadd.f32 %v1025_v58, %v915_v33 }
 0x1f8   :  { %v853_v61 = vadd.f32 %v1053_v59, %v804_v60 }
 0x1fa   :  { %859 = vst [vmem:[#allocation8 + $0x18] sm:$0xff] %v853_v61 }
 0x1fb   :  { %1210 = shalt.err (!%p1207_p5)
}
 0x1fc   :  { %871 = dma.vmem_to_hbm [thread:$0]  %s866_s12, 512, %s1391_s5, [#allocation4], %s1229_s28, %s1229_s28, %s1230_s29  }
 0x1fd   :  { %1223 = dma.done.wait [#allocation4], 512  }
 0x1fe   :  { %1224 = vsyncadd [#allocation4], 4294966784 }
 0x1ff   :  { %875 = vsyncpa [#allocation3], 1 }
 0x200   :  { %876 = vsyncpa [#allocation6], 1 }
 0x201   :  { %877 = vsyncpa [#allocation4], 1 }

</bundles_post_ra>
